<compile_context>
chip_gen: v7x
topology: tpu7x:2x2x1
jax: 0.10.0
libtpu: 0.0.40
codegen_flags: <defaults>
</compile_context>

<pallas_src>
import math

import jax
import jax.numpy as jnp
from jax.experimental import pallas as pl
from jax.experimental.pallas import tpu as pltpu

_LANE = 128


def _round_up(x, m):
    return ((x + m - 1) // m) * m


def _divisor_tile(dim, target):
    """Largest multiple of 128 that divides `dim` (a 128-multiple) and is <= target."""
    t = max(_LANE, (min(target, dim) // _LANE) * _LANE)
    while dim % t:
        t -= _LANE
    return t


def _padded_dim_and_tile(n, target):
    """Pad `n` to 128 and pick a tile.  If the 128-padded size only admits tiny
    tiles, pad further to a multiple of `target` (mem-bound kernels at 128-wide
    tiles run ~3x below HBM roofline vs ~85% at 512)."""
    np128 = _round_up(n, _LANE)
    if np128 <= target:
        return np128, np128
    t = _divisor_tile(np128, target)
    if 2 * t >= target:
        return np128, t
    return _round_up(np128, target), target


def _vmem_budget_bytes():
    """Per-generation scoped VMEM budget (v5e/v6e: 128 MiB physical, v7x: 64 MiB)."""
    try:
        phys = int(pltpu.get_tpu_info().vmem_capacity_bytes)
    except Exception:
        phys = 64 * 1024 * 1024
    return max(16 * 1024 * 1024, phys // 2)


# ---------------- stage 1: support = X @ W ----------------
def _xw_kernel(x_ref, w_ref, o_ref):
    # X tile is cast to the MXU compute dtype in-kernel, so unpadded f32 inputs
    # can be streamed straight from HBM without a wrapper-side pad/cast pass.
    o_ref[...] = jnp.dot(
        x_ref[...].astype(w_ref.dtype), w_ref[...],
        preferred_element_type=jnp.float32,
    ).astype(o_ref.dtype)


# -------- stage 2a: out = adj_strip @ support (+ bias), support VMEM-resident --------
def _agg_resident_kernel(adj_ref, sup_ref, b_ref, o_ref):
    a = adj_ref[...].astype(sup_ref.dtype)
    out = jnp.dot(a, sup_ref[...], preferred_element_type=jnp.float32)
    o_ref[...] = (out + b_ref[...]).astype(o_ref.dtype)


# -------- stage 2b: fallback, accumulate over adj k-tiles (support streamed) --------
def _agg_ktiled_kernel(adj_ref, sup_ref, b_ref, o_ref, acc_ref):
    k = pl.program_id(1)

    @pl.when(k == 0)
    def _():
        acc_ref[...] = jnp.zeros_like(acc_ref)

    acc_ref[...] += jnp.dot(
        adj_ref[...].astype(sup_ref.dtype), sup_ref[...],
        preferred_element_type=jnp.float32,
    )

    @pl.when(k == pl.num_programs(1) - 1)
    def _():
        o_ref[...] = (acc_ref[...] + b_ref[...]).astype(o_ref.dtype)


def graph_convolution(x, adj, weight, bias=None, *, compute_dtype=jnp.bfloat16):
    """Pallas GCN forward: adj @ (x @ weight) + bias (f32 output)."""
    n, in_f = x.shape
    in_f_w, out_f = weight.shape
    assert in_f == in_f_w
    assert adj.shape == (n, n)

    cbytes = jnp.dtype(compute_dtype).itemsize
    budget = _vmem_budget_bytes()
    fit = int(budget * 0.9)

    # ---- dimension padding / tile selection ----
    n_pad, tm = _padded_dim_and_tile(n, 512)
    # Keep >=2 row tiles so the "parallel" row axis shards across both v7x
    # TensorCores (cheap on single-TC v5e/v6e as well).
    if n_pad // tm < 2 and n_pad >= 2 * _LANE:
        tm = _divisor_tile(n_pad, n_pad // 2)

    in_f_pad = _round_up(in_f, _LANE)
    out_f_pad, tns = _padded_dim_and_tile(out_f, 512)

    # ---- input staging: only pad/cast in the wrapper when padding is needed ----
    x_direct = (n == n_pad) and (in_f == in_f_pad)
    if x_direct:
        x_in = x                      # streamed as-is, cast in-kernel
        x_bytes = x.dtype.itemsize
    else:
        x_in = (jnp.zeros((n_pad, in_f_pad), compute_dtype)
                .at[:n, :in_f].set(x.astype(compute_dtype)))
        x_bytes = cbytes

    adj_direct = (n == n_pad)
    if adj_direct:
        adj_in = adj                  # streamed as-is, cast in-kernel
        adj_bytes = adj.dtype.itemsize
    else:
        adj_in = (jnp.zeros((n_pad, n_pad), compute_dtype)
                  .at[:n, :n].set(adj.astype(compute_dtype)))
        adj_bytes = cbytes

    wp = (jnp.zeros((in_f_pad, out_f_pad), compute_dtype)
          .at[:in_f, :out_f].set(weight.astype(compute_dtype)))

    bias2d = jnp.zeros((1, out_f_pad), jnp.float32)
    if bias is not None:
        bias2d = bias2d.at[0, :out_f].set(bias.astype(jnp.float32))

    # ---------------- stage 1: support = X @ W ----------------
    def s1_vmem(tms_, tns_):
        return (2 * tms_ * in_f_pad * x_bytes       # X tile (double-buffered)
                + tms_ * in_f_pad * cbytes          # in-kernel cast scratch
                + 2 * in_f_pad * tns_ * cbytes      # W tile
                + 2 * tms_ * tns_ * cbytes)         # support tile

    tms = _divisor_tile(n_pad, 1024)
    while tms > _LANE and s1_vmem(tms, tns) > fit:
        tms = _divisor_tile(n_pad, tms - _LANE)
    while tns > _LANE and s1_vmem(tms, tns) > fit:
        tns = _divisor_tile(out_f_pad, tns - _LANE)

    support = pl.pallas_call(
        _xw_kernel,
        out_shape=jax.ShapeDtypeStruct((n_pad, out_f_pad), compute_dtype),
        grid_spec=pltpu.PrefetchScalarGridSpec(
            num_scalar_prefetch=0,
            grid=(n_pad // tms, out_f_pad // tns),
            in_specs=[
                pl.BlockSpec((tms, in_f_pad), lambda i, j: (i, 0)),
                pl.BlockSpec((in_f_pad, tns), lambda i, j: (0, j)),
            ],
            out_specs=pl.BlockSpec((tms, tns), lambda i, j: (i, j)),
        ),
        compiler_params=pltpu.CompilerParams(
            dimension_semantics=("parallel", "parallel"),
            vmem_limit_bytes=budget,
        ),
        cost_estimate=pl.CostEstimate(
            flops=2 * n_pad * in_f_pad * out_f_pad,
            transcendentals=0,
            bytes_accessed=(n_pad * in_f_pad * x_bytes
                            + in_f_pad * out_f_pad * cbytes
                            + n_pad * out_f_pad * cbytes),
        ),
    )(x_in, wp)

    # ---------------- stage 2: out = adj @ support + bias ----------------
    cparams2 = pltpu.CompilerParams(
        dimension_semantics=("parallel",),
        vmem_limit_bytes=budget,
    )

    def resident_vmem(tm_):
        return (2 * n_pad * out_f_pad * cbytes      # resident support (2 bufs)
                + 2 * tm_ * n_pad * adj_bytes       # adj row strip (2 bufs)
                + tm_ * n_pad * cbytes              # in-kernel cast scratch
                + 2 * tm_ * out_f_pad * 4           # f32 output tile
                + 2 * out_f_pad * 4)                # bias

    if resident_vmem(tm) <= fit:
        # Preferred: support DMA'd exactly once (constant-index BlockSpec),
        # adj streamed as (tm, n_pad) strips -> no support re-reads.
        out_pad = pl.pallas_call(
            _agg_resident_kernel,
            out_shape=jax.ShapeDtypeStruct((n_pad, out_f_pad), jnp.float32),
            grid_spec=pltpu.PrefetchScalarGridSpec(
                num_scalar_prefetch=0,
                grid=(n_pad // tm,),
                in_specs=[
                    pl.BlockSpec((tm, n_pad), lambda i: (i, 0)),
                    pl.BlockSpec((n_pad, out_f_pad), lambda i: (0, 0)),  # resident
                    pl.BlockSpec((1, out_f_pad), lambda i: (0, 0)),
                ],
                out_specs=pl.BlockSpec((tm, out_f_pad), lambda i: (i, 0)),
            ),
            compiler_params=cparams2,
            cost_estimate=pl.CostEstimate(
                flops=2 * n_pad * n_pad * out_f_pad,
                transcendentals=0,
                bytes_accessed=(n_pad * n_pad * adj_bytes
                                + n_pad * out_f_pad * cbytes
                                + n_pad * out_f_pad * 4 + out_f_pad * 4),
            ),
        )(adj_in, support, bias2d)
    else:
        # Fallback: k-tiled accumulation (large tiles; support re-read factor
        # n_pad/tm is minimized by the big tm chosen above).
        tk = _divisor_tile(n_pad, 2048)

        def ktiled_vmem(tm_, tk_):
            return (2 * tm_ * tk_ * adj_bytes + tm_ * tk_ * cbytes
                    + 2 * tk_ * out_f_pad * cbytes
                    + 2 * tm_ * out_f_pad * 4
                    + tm_ * out_f_pad * 4          # accumulator
                    + 2 * out_f_pad * 4)

        while tk > _LANE and ktiled_vmem(tm, tk) > fit:
            tk = _divisor_tile(n_pad, tk - _LANE)
        while tm > _LANE and ktiled_vmem(tm, tk) > fit:
            tm = _divisor_tile(n_pad, tm - _LANE)

        grid = (n_pad // tm, n_pad // tk)
        out_pad = pl.pallas_call(
            _agg_ktiled_kernel,
            out_shape=jax.ShapeDtypeStruct((n_pad, out_f_pad), jnp.float32),
            grid_spec=pltpu.PrefetchScalarGridSpec(
                num_scalar_prefetch=0,
                grid=grid,
                in_specs=[
                    pl.BlockSpec((tm, tk), lambda i, k: (i, k)),
                    pl.BlockSpec((tk, out_f_pad), lambda i, k: (k, 0)),
                    pl.BlockSpec((1, out_f_pad), lambda i, k: (0, 0)),
                ],
                out_specs=pl.BlockSpec((tm, out_f_pad), lambda i, k: (i, 0)),
                scratch_shapes=[pltpu.VMEM((tm, out_f_pad), jnp.float32)],
            ),
            compiler_params=pltpu.CompilerParams(
                dimension_semantics=("parallel", "arbitrary"),
                vmem_limit_bytes=budget,
            ),
            cost_estimate=pl.CostEstimate(
                flops=2 * n_pad * n_pad * out_f_pad,
                transcendentals=0,
                bytes_accessed=(n_pad * n_pad * adj_bytes
                                + grid[0] * n_pad * out_f_pad * cbytes
                                + n_pad * out_f_pad * 4 + out_f_pad * 4),
            ),
        )(adj_in, support, bias2d)

    if n_pad == n and out_f_pad == out_f:
        return out_pad
    return out_pad[:n, :out_f]


def init_gcn_params(key, in_features, out_features, bias=True):
    """Deterministic init matching GraphConvolution.reset_parameters()."""
    stdv = 1.0 / math.sqrt(out_features)
    kw, kb = jax.random.split(key)
    weight = jax.random.uniform(
        kw, (in_features, out_features), jnp.float32, minval=-stdv, maxval=stdv
    )
    b = None
    if bias:
        b = jax.random.uniform(
            kb, (out_features,), jnp.float32, minval=-stdv, maxval=stdv
        )
    return weight, b


if __name__ == "__main__":
    key = jax.random.PRNGKey(0)
    k_x, k_adj, k_p = jax.random.split(key, 3)

    N = 64      # number of graph nodes
    IN_F = 32   # in_features
    OUT_F = 16  # out_features

    x = jax.random.normal(k_x, (N, IN_F), jnp.float32)

    # Dense, row-normalized adjacency (dense materialization of torch.spmm's operand).
    a_raw = (jax.random.uniform(k_adj, (N, N)) < 0.2).astype(jnp.float32)
    adj = a_raw + jnp.eye(N, dtype=jnp.float32)
    adj = adj / jnp.sum(adj, axis=1, keepdims=True)

    weight, bias = init_gcn_params(k_p, IN_F, OUT_F, bias=True)

    out = graph_convolution(x, adj, weight, bias)
    out = jax.block_until_ready(out)

    # Reference emulating the kernel's bf16-input / f32-accumulate arithmetic.
    xb, wb, ab = (t.astype(jnp.bfloat16) for t in (x, weight, adj))
    sup_ref = jnp.dot(xb, wb, preferred_element_type=jnp.float32).astype(jnp.bfloat16)
    ref = jnp.dot(ab, sup_ref, preferred_element_type=jnp.float32) + bias[None, :]

    assert out.shape == (N, OUT_F)
    assert jnp.allclose(out, ref, atol=2e-3, rtol=2e-3), float(
        jnp.max(jnp.abs(out - ref))
    )

    print("KERNEL_OK")
</pallas_src>

<mosaic_0001>
module attributes {stable_mosaic.version = 11 : i64} {
  func.func @_xw_kernel(%arg0: i32, %arg1: i32, %arg2: memref<128x128xbf16, #tpu.memory_space<vmem>>, %arg3: memref<128x128xbf16, #tpu.memory_space<vmem>>, %arg4: memref<128x128xbf16, #tpu.memory_space<vmem>>) attributes {dimension_semantics = [#tpu.dimension_semantics<parallel>, #tpu.dimension_semantics<parallel>], iteration_bounds = array<i64: 1, 1>, scalar_prefetch = 0 : i64, scratch_operands = 0 : i64, tpu.core_type = #tpu.core_type<tc>, window_params = [{transform_indices = @transform_0, window_bounds = array<i64: 128, 128>}, {transform_indices = @transform_1, window_bounds = array<i64: 128, 128>}, {transform_indices = @transform_2, window_bounds = array<i64: 128, 128>}]} {
    %c0 = arith.constant 0 : index
    %c0_0 = arith.constant 0 : index
    %0 = vector.load %arg2[%c0, %c0_0] : memref<128x128xbf16, #tpu.memory_space<vmem>>, vector<128x128xbf16>
    %c0_1 = arith.constant 0 : index
    %c0_2 = arith.constant 0 : index
    %1 = vector.load %arg3[%c0_1, %c0_2] : memref<128x128xbf16, #tpu.memory_space<vmem>>, vector<128x128xbf16>
    %cst = arith.constant dense<0.000000e+00> : vector<128x128xf32>
    %2 = tpu.matmul %0, %1, %cst {dimension_numbers = #tpu.dot_dimension_numbers<[1], [0], [0], [1], [0, 0, 1, 1], [], []>} : vector<128x128xbf16>, vector<128x128xbf16>, vector<128x128xf32> -> vector<128x128xf32>
    %3 = arith.truncf %2 : vector<128x128xf32> to vector<128x128xbf16>
    %c0_3 = arith.constant 0 : index
    %c0_4 = arith.constant 0 : index
    %4 = vector.load %arg4[%c0_3, %c0_4] : memref<128x128xbf16, #tpu.memory_space<vmem>>, vector<128x128xbf16>
    tpu.vector_store %arg4[%c0_3, %c0_4], %3 {strides = array<i32>} : memref<128x128xbf16, #tpu.memory_space<vmem>>, vector<128x128xbf16>,
    return
  }
  func.func @transform_0(%arg0: i32, %arg1: i32) -> (i32, i32) {
    %c0_i32 = arith.constant 0 : i32
    %c0_i32_0 = arith.constant 0 : i32
    return %arg0, %c0_i32 : i32, i32
  }
  func.func @transform_1(%arg0: i32, %arg1: i32) -> (i32, i32) {
    %c0_i32 = arith.constant 0 : i32
    %c0_i32_0 = arith.constant 0 : i32
    return %c0_i32, %arg1 : i32, i32
  }
  func.func @transform_2(%arg0: i32, %arg1: i32) -> (i32, i32) {
    %c0_i32 = arith.constant 0 : i32
    return %arg0, %arg1 : i32, i32
  }
}

</mosaic_0001>

<bundles_post_ra>
// kernel: tpu_custom_call.1
= control target key start
LH: loop header
LB: loop body
LE: loop exit
PB: predicated region body
PF: predicated region fallthrough
CT: control target
= control target key end

     0   :  { %7 = vsyncpa [#allocation3], 0  ;;  %s681_s0 = inlined_call_operand.hbm [shape: bf16[128,128], index: 0, kind: input, shape index: {}]   ;;  %s682_s1 = inlined_call_operand.hbm [shape: bf16[128,128], index: 1, kind: input, shape index: {}]   ;;  %s683_s2 = inlined_call_operand.hbm [shape: bf16[128,128], index: 2, kind: output, shape index: {}]  }
   0x1   :  { %8 = vsyncpa [#allocation6], 0 }
   0x2   :  { %9 = vsyncpa [#allocation4], 0  ;;  %s616_s9 = smov [#allocation2]   ;;  %s544_s13 = scalar_lea.hbm %s681_s0, 1024 }
   0x3   :  { %s15_s10 = sshll.u32 %s616_s9, 4  ;;  %p545_p0 = scmp.ne.s32.totalorder %s681_s0, %s544_s13  ;;  %s16_s10 = int_to_ptr.vmem [resolvable:$true] %s15_s10 }
   0x4   :  { %p548_p1 = scmp.lt.u32.totalorder %s544_s13, %s681_s0 }
   0x6   :  { %p550_p2 = pnand %p548_p1, %p545_p0 }
   0x8   :  { %553 = shalt.err (!%p550_p2)
}
   0x9   :  { %s554_s18 = scalar_lea.vmem %s16_s10, 1024  ;;  %p559_p4 = scmp.lt.s32.totalorder %s16_s10, %s16_s10 }
   0xa   :  { %p555_p3 = scmp.ne.s32.totalorder %s16_s10, %s554_s18  ;;  %p560_p5 = scmp.lt.s32.totalorder %s554_s18, %s554_s18 }
   0xc   :  { %p561_p6 = por %p560_p5, %p559_p4 }
   0xe   :  { %p562_p7 = pnand %p561_p6, %p555_p3 }
  0x10   :  { %565 = shalt.err (!%p562_p7)
}
  0x11   :  { %s617_s19 = smov 64   ;;  %s618_s20 = smov 4  }
  0x12   :  { %21 = dma.hbm_to_vmem [thread:$0]  %s681_s0, 1024, %s16_s10, [#allocation3], %s617_s19, %s617_s19, %s618_s20  }
  0x13   :  { %s619_s23 = smov [#allocation5]   ;;  %s566_s27 = scalar_lea.hbm %s682_s1, 1024 }
  0x14   :  { %s27_s24 = sshll.u32 %s619_s23, 4  ;;  %p567_p8 = scmp.ne.s32.totalorder %s682_s1, %s566_s27  ;;  %s28_s24 = int_to_ptr.vmem [resolvable:$true] %s27_s24 }
  0x15   :  { %p570_p9 = scmp.lt.u32.totalorder %s566_s27, %s682_s1 }
  0x17   :  { %p572_p10 = pnand %p570_p9, %p567_p8 }
  0x19   :  { %575 = shalt.err (!%p572_p10)
}
  0x1a   :  { %s576_s4 = scalar_lea.vmem %s28_s24, 1024  ;;  %p581_p12 = scmp.lt.s32.totalorder %s28_s24, %s28_s24 }
  0x1b   :  { %p577_p11 = scmp.ne.s32.totalorder %s28_s24, %s576_s4  ;;  %p582_p13 = scmp.lt.s32.totalorder %s576_s4, %s576_s4 }
  0x1d   :  { %p583_p0 = por %p582_p13, %p581_p12 }
  0x1f   :  { %p584_p1 = pnand %p583_p0, %p577_p11 }
  0x21   :  { %587 = shalt.err (!%p584_p1)
}
  0x22   :  { %33 = dma.hbm_to_vmem [thread:$0]  %s682_s1, 1024, %s28_s24, [#allocation6], %s617_s19, %s617_s19, %s618_s20  }
  0x23   :  { %610 = dma.done.wait [#allocation3], 1024  }
  0x24   :  { %611 = vsyncadd [#allocation3], 4294966272 }
  0x25   :  { %612 = dma.done.wait [#allocation6], 1024  }
  0x26   :  { %613 = vsyncadd [#allocation6], 4294966272  ;;  %v528_v0 = vld [vmem:[#allocation5] sm:$0xff]   ;;  %v529_v1 = vld [vmem:[#allocation5 + $0x8] sm:$0xff]   ;;  %s620_s1 = smov [#allocation7]  }
  0x27   :  { %475 = vmatprep.subr.bf16.mxu0 %v528_v0  ;;  %507 = vmatprep.subr.bf16.mxu1 %v528_v0  ;;  %v530_v2 = vld [vmem:[#allocation5 + $0x10] sm:$0xff]   ;;  %v531_v3 = vld [vmem:[#allocation5 + $0x18] sm:$0xff]   ;;  %v536_v4 = vld [vmem:[#allocation2] sm:$0xff]   ;;  %s351_s6 = sshll.u32 %s620_s1, 4  ;;  %s352_s6 = int_to_ptr.vmem [resolvable:$true] %s351_s6 }
  0x28   :  { %476 = vmatpush3.bf16.msra.mxu0 %v528_v0  ;;  %515 = vmatpush3.bf16.msra.mxu1 %v528_v0  ;;  %v537_v5 = vld [vmem:[#allocation2 + $0x20] sm:$0xff]   ;;  %v533_v7 = vld [vmem:[#allocation5 + $0x28] sm:$0xff]   ;;  %v534_v8 = vld [vmem:[#allocation5 + $0x30] sm:$0xff]   ;;  %s588_s7 = scalar_lea.vmem %s352_s6, 1024  ;;  %p593_p3 = scmp.lt.s32.totalorder %s352_s6, %s352_s6 }
  0x29   :  { %477 = vmatprep.subr.bf16.mxu0 %v529_v1  ;;  %508 = vmatprep.subr.bf16.mxu1 %v529_v1  ;;  %v532_v6 = vld [vmem:[#allocation5 + $0x20] sm:$0xff]   ;;  %v535_v9 = vld [vmem:[#allocation5 + $0x38] sm:$0xff]   ;;  %v538_v10 = vld [vmem:[#allocation2 + $0x8] sm:$0xff]   ;;  %p589_p2 = scmp.ne.s32.totalorder %s352_s6, %s588_s7  ;;  %p594_p4 = scmp.lt.s32.totalorder %s588_s7, %s588_s7 }
  0x2a   :  { %491 = vmatprep.mubr.bf16.mxu0 %v536_v4  ;;  %499 = vmatprep.mubr.bf16.mxu1 %v537_v5  ;;  %v539_v11 = vld [vmem:[#allocation2 + $0x28] sm:$0xff]   ;;  %v540_v12 = vld [vmem:[#allocation2 + $0x10] sm:$0xff]   ;;  %v542_v14 = vld [vmem:[#allocation2 + $0x18] sm:$0xff]  }
  0x2b   :  { %v541_v13 = vld [vmem:[#allocation2 + $0x30] sm:$0xff]   ;;  %v543_v15 = vld [vmem:[#allocation2 + $0x38] sm:$0xff]   ;;  %p595_p5 = por %p594_p4, %p593_p3 }
  0x2c   :  { %478 = vmatpush3.bf16.msra.mxu0 %v529_v1  ;;  %516 = vmatpush3.bf16.msra.mxu1 %v529_v1 }
  0x2d   :  { %479 = vmatprep.subr.bf16.mxu0 %v530_v2  ;;  %509 = vmatprep.subr.bf16.mxu1 %v530_v2  ;;  %p596_p6 = pnand %p595_p5, %p589_p2 }
  0x30   :  { %480 = vmatpush3.bf16.msra.mxu0 %v530_v2  ;;  %517 = vmatpush3.bf16.msra.mxu1 %v530_v2 }
  0x31   :  { %481 = vmatprep.subr.bf16.mxu0 %v531_v3  ;;  %510 = vmatprep.subr.bf16.mxu1 %v531_v3 }
  0x34   :  { %482 = vmatpush3.bf16.msra.mxu0 %v531_v3  ;;  %518 = vmatpush3.bf16.msra.mxu1 %v531_v3 }
  0x35   :  { %483 = vmatprep.subr.bf16.mxu0 %v532_v6  ;;  %511 = vmatprep.subr.bf16.mxu1 %v532_v6 }
  0x38   :  { %484 = vmatpush3.bf16.msra.mxu0 %v532_v6  ;;  %519 = vmatpush3.bf16.msra.mxu1 %v532_v6 }
  0x39   :  { %485 = vmatprep.subr.bf16.mxu0 %v533_v7  ;;  %512 = vmatprep.subr.bf16.mxu1 %v533_v7 }
  0x3c   :  { %486 = vmatpush3.bf16.msra.mxu0 %v533_v7  ;;  %520 = vmatpush3.bf16.msra.mxu1 %v533_v7 }
  0x3d   :  { %487 = vmatprep.subr.bf16.mxu0 %v534_v8  ;;  %513 = vmatprep.subr.bf16.mxu1 %v534_v8 }
  0x40   :  { %488 = vmatpush3.bf16.msra.mxu0 %v534_v8  ;;  %521 = vmatpush3.bf16.msra.mxu1 %v534_v8 }
  0x41   :  { %489 = vmatprep.subr.bf16.mxu0 %v535_v9  ;;  %514 = vmatprep.subr.bf16.mxu1 %v535_v9 }
  0x44   :  { %490 = vmatpush3.bf16.msra.mxu0 %v535_v9  ;;  %522 = vmatpush3.bf16.msra.mxu1 %v535_v9 }
  0x47   :  { %492 = vmatmul.mubr.bf16.vlgmr.msra.gmra.mrb[0].mxu0 %v538_v10  ;;  %500 = vmatmul.mubr.bf16.vlgmr.msra.gmra.mrb[0].mxu1 %v539_v11 }
  0x48   :  { %495 = vmatprep.mubr.bf16.mxu0 %v540_v12  ;;  %503 = vmatprep.mubr.bf16.mxu1 %v541_v13 }
  0x4f   :  { %496 = vmatmul.mubr.bf16.gmra.mrb[4].mxu0 %v542_v14  ;;  %504 = vmatmul.mubr.bf16.gmra.mrb[4].mxu1 %v543_v15 }
 0x11a   :  { %v493_v16 = vpop.f32.mrb[0].mxu0  ;;  %v501_v17 = vpop.f32.mrb[0].mxu1 }
 0x11b   :  { %v203_v18 = vpop.f32.mrb[1].mxu0  ;;  %v235_v19 = vpop.f32.mrb[1].mxu1 }
 0x11c   :  { %v494_v20 = vpop.f32.mrb[2].mxu0  ;;  %v502_v21 = vpop.f32.mrb[2].mxu1 }
 0x11d   :  { %v420_v22 = vpack.c.bf16 %v494_v20, %v493_v16  ;;  %v440_v23 = vpack.c.bf16 %v502_v21, %v501_v17  ;;  %v206_v24 = vpop.f32.mrb[3].mxu0  ;;  %v238_v25 = vpop.f32.mrb[3].mxu1 }
 0x11e   :  { %v415_v26 = vpack.c.bf16 %v206_v24, %v203_v18  ;;  %v435_v27 = vpack.c.bf16 %v238_v25, %v235_v19 }
 0x11f   :  { %452 = vst [vmem:[#allocation7 + $0x8] sm:$0xff] %v420_v22   ;;  %456 = vst [vmem:[#allocation7 + $0x28] sm:$0xff] %v440_v23  }
 0x120   :  { %416 = vst [vmem:[#allocation7] sm:$0xff] %v415_v26   ;;  %455 = vst [vmem:[#allocation7 + $0x20] sm:$0xff] %v435_v27  }
 0x122   :  { %v497_v28 = vpop.f32.mrb[4].mxu0  ;;  %v505_v29 = vpop.f32.mrb[4].mxu1 }
 0x123   :  { %v219_v30 = vpop.f32.mrb[5].mxu0  ;;  %v251_v31 = vpop.f32.mrb[5].mxu1 }
 0x124   :  { %v498_v32 = vpop.f32.mrb[6].mxu0  ;;  %v506_v33 = vpop.f32.mrb[6].mxu1 }
 0x125   :  { %v430_v34 = vpack.c.bf16 %v498_v32, %v497_v28  ;;  %v450_v35 = vpack.c.bf16 %v506_v33, %v505_v29  ;;  %v222_v36 = vpop.f32.mrb[7].mxu0  ;;  %v254_v37 = vpop.f32.mrb[7].mxu1 }
 0x126   :  { %v425_v38 = vpack.c.bf16 %v222_v36, %v219_v30  ;;  %v445_v39 = vpack.c.bf16 %v254_v37, %v251_v31 }
 0x127   :  { %454 = vst [vmem:[#allocation7 + $0x18] sm:$0xff] %v430_v34   ;;  %458 = vst [vmem:[#allocation7 + $0x38] sm:$0xff] %v450_v35  }
 0x128   :  { %453 = vst [vmem:[#allocation7 + $0x10] sm:$0xff] %v425_v38   ;;  %457 = vst [vmem:[#allocation7 + $0x30] sm:$0xff] %v445_v39  }
 0x129   :  { %599 = shalt.err (!%p596_p6)
}
 0x12a   :  { %s600_s10 = scalar_lea.hbm %s683_s2, 1024 }
 0x12b   :  { %p601_p7 = scmp.ne.s32.totalorder %s683_s2, %s600_s10  ;;  %p604_p8 = scmp.lt.u32.totalorder %s600_s10, %s683_s2 }
 0x12d   :  { %p606_p9 = pnand %p604_p8, %p601_p7 }
 0x12f   :  { %609 = shalt.err (!%p606_p9)
}
 0x130   :  { %357 = dma.vmem_to_hbm [thread:$0]  %s352_s6, 1024, %s683_s2, [#allocation4], %s617_s19, %s617_s19, %s618_s20  }
 0x131   :  { %614 = dma.done.wait [#allocation4], 1024  }
 0x132   :  { %615 = vsyncadd [#allocation4], 4294966272 }
 0x133   :  { %361 = vsyncpa [#allocation3], 1 }
 0x134   :  { %362 = vsyncpa [#allocation6], 1 }
 0x135   :  { %363 = vsyncpa [#allocation4], 1 }

</bundles_post_ra>
